<compile_context>
chip_gen: v7x
topology: tpu7x:2x2x1
jax: 0.10.0
libtpu: 0.0.40
codegen_flags: <defaults>
</compile_context>

<pallas_src>
import jax
import jax.numpy as jnp
from jax.experimental import pallas as pl
from jax.experimental.pallas import tpu as pltpu


def _sigmoid(x):
    # tanh form: exact, and the transcendental lands on the EUP slot instead
    # of a multi-op VPU divide sequence.
    return 0.5 * (jnp.tanh(0.5 * x) + 1.0)


def generator_kernel(x_ref, w1_ref, b1_ref, w2_ref, b2_ref,
                     w_out_ref, b_out_ref, out_ref):
    """One batch tile of packed rows: (TB, P*E) bf16 -> (TB, P*O) f32 ReLU'd.

    Each row holds P samples side-by-side in the lane dim; weights are
    block-diagonal so all per-sample lane layouts line up across gates.

    w1_ref: (3, P*E, P*H)   stacked [i, g, o] block-diag weights, LSTM layer 1
    b1_ref: (3, 1, P*H)     stacked fused biases (b_ih + b_hh), sample-tiled
    w2_ref: (3, P*H, P*H2)  same for LSTM layer 2
    b2_ref: (3, 1, P*H2)
    w_out_ref: (P*H2, P*O)  block-diag output weight
    b_out_ref: (1, P*O)
    """
    x = x_ref[...]                                                    # bf16

    def gate(h, w_ref, b_ref, g):
        # bf16 x bf16 MXU matmul, f32 accumulate, f32 bias add.
        return jnp.dot(h, w_ref[g], preferred_element_type=jnp.float32) + b_ref[g]

    # ---------- LSTM layer 1, single step, zero (h0, c0) ----------
    # forget gate dropped (c0 == 0): c1 = sigmoid(i)*tanh(g), h1 = sigmoid(o)*tanh(c1)
    i1 = _sigmoid(gate(x, w1_ref, b1_ref, 0))
    g1 = jnp.tanh(gate(x, w1_ref, b1_ref, 1))
    o1 = _sigmoid(gate(x, w1_ref, b1_ref, 2))
    h1 = (o1 * jnp.tanh(i1 * g1)).astype(jnp.bfloat16)                # (TB, P*H)

    # ---------- LSTM layer 2, single step, zero (h0, c0) ----------
    i2 = _sigmoid(gate(h1, w2_ref, b2_ref, 0))
    g2 = jnp.tanh(gate(h1, w2_ref, b2_ref, 1))
    o2 = _sigmoid(gate(h1, w2_ref, b2_ref, 2))
    h2 = (o2 * jnp.tanh(i2 * g2)).astype(jnp.bfloat16)                # (TB, P*H2)

    # ---------- Linear + ReLU ----------
    y = jnp.dot(h2, w_out_ref[...],
                preferred_element_type=jnp.float32) + b_out_ref[...]  # (TB, P*O)
    out_ref[...] = jnp.maximum(y, 0.0)


def init_generator_params(key, embedding_input_dim, hidden_dim, output_dim):
    """Deterministic init matching the parameter shapes of the PyTorch module."""
    E, H, O = embedding_input_dim, hidden_dim, output_dim
    H2 = H // 2
    ks = jax.random.split(key, 10)

    def u(k, shape, bound):
        return jax.random.uniform(k, shape, jnp.float32, -bound, bound)

    s1 = 1.0 / float(jnp.sqrt(H))
    s2 = 1.0 / float(jnp.sqrt(H2))
    return dict(
        w_ih1=u(ks[0], (4 * H, E), s1),   w_hh1=u(ks[1], (4 * H, H), s1),
        b_ih1=u(ks[2], (4 * H,), s1),     b_hh1=u(ks[3], (4 * H,), s1),
        w_ih2=u(ks[4], (4 * H2, H), s2),  w_hh2=u(ks[5], (4 * H2, H2), s2),
        b_ih2=u(ks[6], (4 * H2,), s2),    b_hh2=u(ks[7], (4 * H2,), s2),
        w_out=u(ks[8], (O, H2), s2),      b_out=u(ks[9], (O,), s2),
    )


def _blockdiag(w, p):
    """(din, dout) -> (p*din, p*dout): p copies of w on the diagonal.

    Sample s's inputs occupy rows [s*din:(s+1)*din] and its outputs occupy
    cols [s*dout:(s+1)*dout] — the same per-sample lane layout for every gate.
    """
    if p == 1:
        return w
    din, dout = w.shape
    out = jnp.zeros((p, din, p, dout), w.dtype)
    for s in range(p):
        out = out.at[s, :, s, :].set(w)
    return out.reshape(p * din, p * dout)


def _pack_gates(w_ih, b_ih, b_hh, hd, p):
    """PyTorch gate order is [i, f, g, o]; drop the dead forget gate (c0==0).

    Returns sample-packed block-diagonal weights (3, p*in, p*hd) in bf16 and
    fused, sample-tiled biases (3, 1, p*hd) in f32, in [i, g, o] order.
    """
    w_t = w_ih.T.astype(jnp.float32)        # (in, 4*hd)
    b = (b_ih + b_hh).astype(jnp.float32)   # (4*hd,)
    gates = (0, 2, 3)                       # i, g, o
    w = jnp.stack([_blockdiag(w_t[:, g * hd:(g + 1) * hd], p) for g in gates])
    bb = jnp.stack([jnp.tile(b[g * hd:(g + 1) * hd], p)[None, :] for g in gates])
    return w.astype(jnp.bfloat16), bb


def generator_forward_batch(xb, params):
    """xb: (B, E) float32 embeddings. Returns (B, O) float32, ReLU'd."""
    B, E = xb.shape
    H = params["w_hh1"].shape[1]
    H2 = params["w_hh2"].shape[1]
    O = params["w_out"].shape[0]

    # ---- sample packing: P samples side-by-side along the 128-lane axis ----
    P = max(1, 128 // max(E, H))
    PE, PH, PH2, PO = P * E, P * H, P * H2, P * O

    # ---- glue: drop forget gate, fold biases, block-diag packing, bf16 ----
    w1, b1 = _pack_gates(params["w_ih1"], params["b_ih1"], params["b_hh1"], H, P)
    w2, b2 = _pack_gates(params["w_ih2"], params["b_ih2"], params["b_hh2"], H2, P)
    w_out = _blockdiag(params["w_out"].T.astype(jnp.float32), P).astype(jnp.bfloat16)
    b_out = jnp.tile(params["b_out"].astype(jnp.float32), P)[None, :]   # (1, PO)

    # ---- tiling over packed rows (1 row = P samples) ----
    ROW_ALIGN = 16                 # bf16 sublane packing -> keep rows % 16 == 0
    MAX_TB = 1024                  # 1024 rows: ~0.3 MiB x tile + ~0.13 MiB out tile
    rows = pl.cdiv(B, P)
    if rows <= ROW_ALIGN:
        TB = ROW_ALIGN
    elif rows <= 2 * MAX_TB:
        # split into >=2 tiles so the "parallel" axis uses both TCs on v7x
        TB = pl.cdiv(pl.cdiv(rows, 2), ROW_ALIGN) * ROW_ALIGN
    else:
        TB = MAX_TB
    rows_pad = pl.cdiv(rows, TB) * TB
    nb = rows_pad // TB
    B_pad = rows_pad * P

    xb = xb.astype(jnp.float32)
    if B_pad != B:
        xb = jnp.zeros((B_pad, E), jnp.float32).at[:B].set(xb)
    # (B_pad, E) -> (rows_pad, P*E): contiguous, sample s of row r at lanes [s*E:(s+1)*E]
    x_packed = xb.reshape(rows_pad, PE).astype(jnp.bfloat16)

    cost = pl.CostEstimate(
        flops=2 * rows_pad * (PE * 3 * PH + PH * 3 * PH2 + PH2 * PO),
        transcendentals=rows_pad * (4 * PH + 4 * PH2),
        bytes_accessed=(2 * (rows_pad * PE + 3 * PE * PH + 3 * PH * PH2 + PH2 * PO)
                        + 4 * (3 * PH + 3 * PH2 + PO + rows_pad * PO)),
    )

    const2 = lambda r: (0, 0)
    const3 = lambda r: (0, 0, 0)
    out = pl.pallas_call(
        generator_kernel,
        out_shape=jax.ShapeDtypeStruct((rows_pad, PO), jnp.float32),
        grid=(nb,),
        in_specs=[
            pl.BlockSpec((TB, PE), lambda r: (r, 0)),       # per-tile packed rows
            pl.BlockSpec((3, PE, PH), const3),              # weights pinned in VMEM
            pl.BlockSpec((3, 1, PH), const3),
            pl.BlockSpec((3, PH, PH2), const3),
            pl.BlockSpec((3, 1, PH2), const3),
            pl.BlockSpec((PH2, PO), const2),
            pl.BlockSpec((1, PO), const2),
        ],
        out_specs=pl.BlockSpec((TB, PO), lambda r: (r, 0)),
        compiler_params=pltpu.CompilerParams(
            dimension_semantics=("parallel",)),             # 2 TCs on v7x
        cost_estimate=cost,
    )(x_packed, w1, b1, w2, b2, w_out, b_out)

    # (rows_pad, P*O) -> (B_pad, O): contiguous un-pack, then drop pad samples.
    return out.reshape(B_pad, O)[:B]


def generator_forward(x, params, *, use_pallas=False):
    """x: (E,) float32 embedding. Returns (O,) float32 — matches the PyTorch
    module's single-embedding forward (.squeeze().squeeze()).

    At B=1 a pallas_call is pure launch + weight-DMA overhead, so the default
    path is plain jnp (review item 7); use_pallas=True routes through the
    batched kernel anyway.
    """
    if use_pallas:
        return generator_forward_batch(x.reshape(1, -1), params)[0]
    return _reference_forward(x, params)


def _reference_forward(x, params):
    """Pure-JAX reference of the PyTorch forward (zero initial LSTM states)."""
    H = params["w_hh1"].shape[1]
    H2 = params["w_hh2"].shape[1]

    def lstm_step_zero_state(xv, w_ih, b_ih, b_hh, hd):
        g = w_ih @ xv + b_ih + b_hh
        i, f, gg, o = g[0:hd], g[hd:2 * hd], g[2 * hd:3 * hd], g[3 * hd:4 * hd]
        c = jax.nn.sigmoid(i) * jnp.tanh(gg)          # f * c0 == 0
        return jax.nn.sigmoid(o) * jnp.tanh(c)

    h1 = lstm_step_zero_state(x, params["w_ih1"], params["b_ih1"], params["b_hh1"], H)
    h2 = lstm_step_zero_state(h1, params["w_ih2"], params["b_ih2"], params["b_hh2"], H2)
    y = params["w_out"] @ h2 + params["b_out"]
    return jnp.maximum(y, 0.0)


if __name__ == "__main__":
    E, H, O = 32, 32, 8   # embedding_input_dim, hidden_dim, output_dim

    key = jax.random.PRNGKey(0)
    k_params, k_x, k_xb, k_xl = jax.random.split(key, 4)
    params = init_generator_params(k_params, E, H, O)

    # bf16 MXU operands (f32 accumulation) -> relaxed tolerance vs f32 reference.
    ATOL = RTOL = 3e-2

    # Single-embedding forward (the PyTorch module's semantics), via the kernel.
    x = jax.random.normal(k_x, (E,), dtype=jnp.float32)
    ref = _reference_forward(x, params)
    out = jax.block_until_ready(generator_forward(x, params, use_pallas=True))
    assert out.shape == (O,)
    assert jnp.allclose(out, ref, atol=ATOL, rtol=RTOL), (out, ref)
    # Default (non-Pallas) fast path for B=1 matches exactly.
    assert jnp.allclose(generator_forward(x, params), ref, atol=1e-6)

    # Batched forward: amortizes launch/DMA overhead across embeddings.
    B = 16
    xb = jax.random.normal(k_xb, (B, E), dtype=jnp.float32)
    outb = jax.block_until_ready(generator_forward_batch(xb, params))
    refb = jax.vmap(lambda v: _reference_forward(v, params))(xb)
    assert outb.shape == (B, O)
    assert jnp.allclose(outb, refb, atol=ATOL, rtol=RTOL), float(jnp.abs(outb - refb).max())

    # Larger batch, not a multiple of the packing factor: exercises sample/row
    # padding and the >=2-tile "parallel" grid.
    B2 = 300
    xl = jax.random.normal(k_xl, (B2, E), dtype=jnp.float32)
    outl = jax.block_until_ready(generator_forward_batch(xl, params))
    refl = jax.vmap(lambda v: _reference_forward(v, params))(xl)
    assert outl.shape == (B2, O)
    assert jnp.allclose(outl, refl, atol=ATOL, rtol=RTOL), float(jnp.abs(outl - refl).max())

    print("KERNEL_OK")
</pallas_src>

<mosaic_0001>
module attributes {stable_mosaic.version = 11 : i64} {
  func.func @generator_kernel(%arg0: i32, %arg1: memref<16x128xbf16, #tpu.memory_space<vmem>>, %arg2: memref<3x128x128xbf16, #tpu.memory_space<vmem>>, %arg3: memref<3x1x128xf32, #tpu.memory_space<vmem>>, %arg4: memref<3x128x64xbf16, #tpu.memory_space<vmem>>, %arg5: memref<3x1x64xf32, #tpu.memory_space<vmem>>, %arg6: memref<64x32xbf16, #tpu.memory_space<vmem>>, %arg7: memref<1x32xf32, #tpu.memory_space<vmem>>, %arg8: memref<16x32xf32, #tpu.memory_space<vmem>>) attributes {dimension_semantics = [#tpu.dimension_semantics<parallel>], iteration_bounds = array<i64: 1>, scalar_prefetch = 0 : i64, scratch_operands = 0 : i64, tpu.core_type = #tpu.core_type<tc>, window_params = [{transform_indices = @transform_0, window_bounds = array<i64: 16, 128>}, {pipeline_mode = #tpu.pipeline_mode<synchronous>, transform_indices = @transform_1, window_bounds = array<i64: 3, 128, 128>}, {pipeline_mode = #tpu.pipeline_mode<synchronous>, transform_indices = @transform_2, window_bounds = array<i64: 3, 1, 128>}, {pipeline_mode = #tpu.pipeline_mode<synchronous>, transform_indices = @transform_3, window_bounds = array<i64: 3, 128, 64>}, {pipeline_mode = #tpu.pipeline_mode<synchronous>, transform_indices = @transform_4, window_bounds = array<i64: 3, 1, 64>}, {pipeline_mode = #tpu.pipeline_mode<synchronous>, transform_indices = @transform_5, window_bounds = array<i64: 64, 32>}, {pipeline_mode = #tpu.pipeline_mode<synchronous>, transform_indices = @transform_6, window_bounds = array<i64: 1, 32>}, {transform_indices = @transform_7, window_bounds = array<i64: 16, 32>}]} {
    %c0 = arith.constant 0 : index
    %c0_0 = arith.constant 0 : index
    %0 = vector.load %arg1[%c0, %c0_0] : memref<16x128xbf16, #tpu.memory_space<vmem>>, vector<16x128xbf16>
    %c0_1 = arith.constant 0 : index
    %c0_2 = arith.constant 0 : index
    %c0_3 = arith.constant 0 : index
    %1 = vector.load %arg2[%c0_1, %c0_2, %c0_3] : memref<3x128x128xbf16, #tpu.memory_space<vmem>>, vector<1x128x128xbf16>
    %2 = vector.shape_cast %1 : vector<1x128x128xbf16> to vector<128x128xbf16>
    %cst = arith.constant dense<0.000000e+00> : vector<16x128xf32>
    %3 = tpu.matmul %0, %2, %cst {dimension_numbers = #tpu.dot_dimension_numbers<[1], [0], [0], [1], [0, 0, 1, 1], [], []>} : vector<16x128xbf16>, vector<128x128xbf16>, vector<16x128xf32> -> vector<16x128xf32>
    %c0_4 = arith.constant 0 : index
    %c0_5 = arith.constant 0 : index
    %c0_6 = arith.constant 0 : index
    %4 = vector.load %arg3[%c0_4, %c0_5, %c0_6] : memref<3x1x128xf32, #tpu.memory_space<vmem>>, vector<1x1x128xf32>
    %5 = vector.shape_cast %4 : vector<1x1x128xf32> to vector<1x128xf32>
    %6 = vector.broadcast %5 : vector<1x128xf32> to vector<16x128xf32>
    %7 = arith.addf %3, %6 : vector<16x128xf32>
    %cst_7 = arith.constant 5.000000e-01 : f32
    %8 = vector.broadcast %cst_7 : f32 to vector<16x128xf32>
    %9 = arith.mulf %8, %7 : vector<16x128xf32>
    %10 = math.tanh %9 : vector<16x128xf32>
    %cst_8 = arith.constant 1.000000e+00 : f32
    %11 = vector.broadcast %cst_8 : f32 to vector<16x128xf32>
    %12 = arith.addf %10, %11 : vector<16x128xf32>
    %cst_9 = arith.constant 5.000000e-01 : f32
    %13 = vector.broadcast %cst_9 : f32 to vector<16x128xf32>
    %14 = arith.mulf %13, %12 : vector<16x128xf32>
    %c1 = arith.constant 1 : index
    %c0_10 = arith.constant 0 : index
    %c0_11 = arith.constant 0 : index
    %15 = vector.load %arg2[%c1, %c0_10, %c0_11] : memref<3x128x128xbf16, #tpu.memory_space<vmem>>, vector<1x128x128xbf16>
    %16 = vector.shape_cast %15 : vector<1x128x128xbf16> to vector<128x128xbf16>
    %cst_12 = arith.constant dense<0.000000e+00> : vector<16x128xf32>
    %17 = tpu.matmul %0, %16, %cst_12 {dimension_numbers = #tpu.dot_dimension_numbers<[1], [0], [0], [1], [0, 0, 1, 1], [], []>} : vector<16x128xbf16>, vector<128x128xbf16>, vector<16x128xf32> -> vector<16x128xf32>
    %c1_13 = arith.constant 1 : index
    %c0_14 = arith.constant 0 : index
    %c0_15 = arith.constant 0 : index
    %18 = vector.load %arg3[%c1_13, %c0_14, %c0_15] : memref<3x1x128xf32, #tpu.memory_space<vmem>>, vector<1x1x128xf32>
    %19 = vector.shape_cast %18 : vector<1x1x128xf32> to vector<1x128xf32>
    %20 = vector.broadcast %19 : vector<1x128xf32> to vector<16x128xf32>
    %21 = arith.addf %17, %20 : vector<16x128xf32>
    %22 = math.tanh %21 : vector<16x128xf32>
    %c2 = arith.constant 2 : index
    %c0_16 = arith.constant 0 : index
    %c0_17 = arith.constant 0 : index
    %23 = vector.load %arg2[%c2, %c0_16, %c0_17] : memref<3x128x128xbf16, #tpu.memory_space<vmem>>, vector<1x128x128xbf16>
    %24 = vector.shape_cast %23 : vector<1x128x128xbf16> to vector<128x128xbf16>
    %cst_18 = arith.constant dense<0.000000e+00> : vector<16x128xf32>
    %25 = tpu.matmul %0, %24, %cst_18 {dimension_numbers = #tpu.dot_dimension_numbers<[1], [0], [0], [1], [0, 0, 1, 1], [], []>} : vector<16x128xbf16>, vector<128x128xbf16>, vector<16x128xf32> -> vector<16x128xf32>
    %c2_19 = arith.constant 2 : index
    %c0_20 = arith.constant 0 : index
    %c0_21 = arith.constant 0 : index
    %26 = vector.load %arg3[%c2_19, %c0_20, %c0_21] : memref<3x1x128xf32, #tpu.memory_space<vmem>>, vector<1x1x128xf32>
    %27 = vector.shape_cast %26 : vector<1x1x128xf32> to vector<1x128xf32>
    %28 = vector.broadcast %27 : vector<1x128xf32> to vector<16x128xf32>
    %29 = arith.addf %25, %28 : vector<16x128xf32>
    %cst_22 = arith.constant 5.000000e-01 : f32
    %30 = vector.broadcast %cst_22 : f32 to vector<16x128xf32>
    %31 = arith.mulf %30, %29 : vector<16x128xf32>
    %32 = math.tanh %31 : vector<16x128xf32>
    %cst_23 = arith.constant 1.000000e+00 : f32
    %33 = vector.broadcast %cst_23 : f32 to vector<16x128xf32>
    %34 = arith.addf %32, %33 : vector<16x128xf32>
    %cst_24 = arith.constant 5.000000e-01 : f32
    %35 = vector.broadcast %cst_24 : f32 to vector<16x128xf32>
    %36 = arith.mulf %35, %34 : vector<16x128xf32>
    %37 = arith.mulf %14, %22 : vector<16x128xf32>
    %38 = math.tanh %37 : vector<16x128xf32>
    %39 = arith.mulf %36, %38 : vector<16x128xf32>
    %40 = arith.truncf %39 : vector<16x128xf32> to vector<16x128xbf16>
    %c0_25 = arith.constant 0 : index
    %c0_26 = arith.constant 0 : index
    %c0_27 = arith.constant 0 : index
    %41 = vector.load %arg4[%c0_25, %c0_26, %c0_27] : memref<3x128x64xbf16, #tpu.memory_space<vmem>>, vector<1x128x64xbf16>
    %42 = vector.shape_cast %41 : vector<1x128x64xbf16> to vector<128x64xbf16>
    %cst_28 = arith.constant dense<0.000000e+00> : vector<16x64xf32>
    %43 = tpu.matmul %40, %42, %cst_28 {dimension_numbers = #tpu.dot_dimension_numbers<[1], [0], [0], [1], [0, 0, 1, 1], [], []>} : vector<16x128xbf16>, vector<128x64xbf16>, vector<16x64xf32> -> vector<16x64xf32>
    %c0_29 = arith.constant 0 : index
    %c0_30 = arith.constant 0 : index
    %c0_31 = arith.constant 0 : index
    %44 = vector.load %arg5[%c0_29, %c0_30, %c0_31] : memref<3x1x64xf32, #tpu.memory_space<vmem>>, vector<1x1x64xf32>
    %45 = vector.shape_cast %44 : vector<1x1x64xf32> to vector<1x64xf32>
    %46 = vector.broadcast %45 : vector<1x64xf32> to vector<16x64xf32>
    %47 = arith.addf %43, %46 : vector<16x64xf32>
    %cst_32 = arith.constant 5.000000e-01 : f32
    %48 = vector.broadcast %cst_32 : f32 to vector<16x64xf32>
    %49 = arith.mulf %48, %47 : vector<16x64xf32>
    %50 = math.tanh %49 : vector<16x64xf32>
    %cst_33 = arith.constant 1.000000e+00 : f32
    %51 = vector.broadcast %cst_33 : f32 to vector<16x64xf32>
    %52 = arith.addf %50, %51 : vector<16x64xf32>
    %cst_34 = arith.constant 5.000000e-01 : f32
    %53 = vector.broadcast %cst_34 : f32 to vector<16x64xf32>
    %54 = arith.mulf %53, %52 : vector<16x64xf32>
    %c1_35 = arith.constant 1 : index
    %c0_36 = arith.constant 0 : index
    %c0_37 = arith.constant 0 : index
    %55 = vector.load %arg4[%c1_35, %c0_36, %c0_37] : memref<3x128x64xbf16, #tpu.memory_space<vmem>>, vector<1x128x64xbf16>
    %56 = vector.shape_cast %55 : vector<1x128x64xbf16> to vector<128x64xbf16>
    %cst_38 = arith.constant dense<0.000000e+00> : vector<16x64xf32>
    %57 = tpu.matmul %40, %56, %cst_38 {dimension_numbers = #tpu.dot_dimension_numbers<[1], [0], [0], [1], [0, 0, 1, 1], [], []>} : vector<16x128xbf16>, vector<128x64xbf16>, vector<16x64xf32> -> vector<16x64xf32>
    %c1_39 = arith.constant 1 : index
    %c0_40 = arith.constant 0 : index
    %c0_41 = arith.constant 0 : index
    %58 = vector.load %arg5[%c1_39, %c0_40, %c0_41] : memref<3x1x64xf32, #tpu.memory_space<vmem>>, vector<1x1x64xf32>
    %59 = vector.shape_cast %58 : vector<1x1x64xf32> to vector<1x64xf32>
    %60 = vector.broadcast %59 : vector<1x64xf32> to vector<16x64xf32>
    %61 = arith.addf %57, %60 : vector<16x64xf32>
    %62 = math.tanh %61 : vector<16x64xf32>
    %c2_42 = arith.constant 2 : index
    %c0_43 = arith.constant 0 : index
    %c0_44 = arith.constant 0 : index
    %63 = vector.load %arg4[%c2_42, %c0_43, %c0_44] : memref<3x128x64xbf16, #tpu.memory_space<vmem>>, vector<1x128x64xbf16>
    %64 = vector.shape_cast %63 : vector<1x128x64xbf16> to vector<128x64xbf16>
    %cst_45 = arith.constant dense<0.000000e+00> : vector<16x64xf32>
    %65 = tpu.matmul %40, %64, %cst_45 {dimension_numbers = #tpu.dot_dimension_numbers<[1], [0], [0], [1], [0, 0, 1, 1], [], []>} : vector<16x128xbf16>, vector<128x64xbf16>, vector<16x64xf32> -> vector<16x64xf32>
    %c2_46 = arith.constant 2 : index
    %c0_47 = arith.constant 0 : index
    %c0_48 = arith.constant 0 : index
    %66 = vector.load %arg5[%c2_46, %c0_47, %c0_48] : memref<3x1x64xf32, #tpu.memory_space<vmem>>, vector<1x1x64xf32>
    %67 = vector.shape_cast %66 : vector<1x1x64xf32> to vector<1x64xf32>
    %68 = vector.broadcast %67 : vector<1x64xf32> to vector<16x64xf32>
    %69 = arith.addf %65, %68 : vector<16x64xf32>
    %cst_49 = arith.constant 5.000000e-01 : f32
    %70 = vector.broadcast %cst_49 : f32 to vector<16x64xf32>
    %71 = arith.mulf %70, %69 : vector<16x64xf32>
    %72 = math.tanh %71 : vector<16x64xf32>
    %cst_50 = arith.constant 1.000000e+00 : f32
    %73 = vector.broadcast %cst_50 : f32 to vector<16x64xf32>
    %74 = arith.addf %72, %73 : vector<16x64xf32>
    %cst_51 = arith.constant 5.000000e-01 : f32
    %75 = vector.broadcast %cst_51 : f32 to vector<16x64xf32>
    %76 = arith.mulf %75, %74 : vector<16x64xf32>
    %77 = arith.mulf %54, %62 : vector<16x64xf32>
    %78 = math.tanh %77 : vector<16x64xf32>
    %79 = arith.mulf %76, %78 : vector<16x64xf32>
    %80 = arith.truncf %79 : vector<16x64xf32> to vector<16x64xbf16>
    %c0_52 = arith.constant 0 : index
    %c0_53 = arith.constant 0 : index
    %81 = vector.load %arg6[%c0_52, %c0_53] : memref<64x32xbf16, #tpu.memory_space<vmem>>, vector<64x32xbf16>
    %cst_54 = arith.constant dense<0.000000e+00> : vector<16x32xf32>
    %82 = tpu.matmul %80, %81, %cst_54 {dimension_numbers = #tpu.dot_dimension_numbers<[1], [0], [0], [1], [0, 0, 1, 1], [], []>} : vector<16x64xbf16>, vector<64x32xbf16>, vector<16x32xf32> -> vector<16x32xf32>
    %c0_55 = arith.constant 0 : index
    %c0_56 = arith.constant 0 : index
    %83 = vector.load %arg7[%c0_55, %c0_56] : memref<1x32xf32, #tpu.memory_space<vmem>>, vector<1x32xf32>
    %84 = vector.broadcast %83 : vector<1x32xf32> to vector<16x32xf32>
    %85 = arith.addf %82, %84 : vector<16x32xf32>
    %cst_57 = arith.constant 0.000000e+00 : f32
    %86 = vector.broadcast %cst_57 : f32 to vector<16x32xf32>
    %87 = arith.maximumf %85, %86 : vector<16x32xf32>
    %c0_58 = arith.constant 0 : index
    %c0_59 = arith.constant 0 : index
    %88 = vector.load %arg8[%c0_58, %c0_59] : memref<16x32xf32, #tpu.memory_space<vmem>>, vector<16x32xf32>
    tpu.vector_store %arg8[%c0_58, %c0_59], %87 {strides = array<i32>} : memref<16x32xf32, #tpu.memory_space<vmem>>, vector<16x32xf32>,
    return
  }
  func.func @transform_0(%arg0: i32) -> (i32, i32) {
    %c0_i32 = arith.constant 0 : i32
    %c0_i32_0 = arith.constant 0 : i32
    return %arg0, %c0_i32 : i32, i32
  }
  func.func @transform_1(%arg0: i32) -> (i32, i32, i32) {
    %c0_i32 = arith.constant 0 : i32
    %c0_i32_0 = arith.constant 0 : i32
    %c0_i32_1 = arith.constant 0 : i32
    %c0_i32_2 = arith.constant 0 : i32
    return %c0_i32, %c0_i32_0, %c0_i32_1 : i32, i32, i32
  }
  func.func @transform_2(%arg0: i32) -> (i32, i32, i32) {
    %c0_i32 = arith.constant 0 : i32
    %c0_i32_0 = arith.constant 0 : i32
    %c0_i32_1 = arith.constant 0 : i32
    %c0_i32_2 = arith.constant 0 : i32
    return %c0_i32, %c0_i32_0, %c0_i32_1 : i32, i32, i32
  }
  func.func @transform_3(%arg0: i32) -> (i32, i32, i32) {
    %c0_i32 = arith.constant 0 : i32
    %c0_i32_0 = arith.constant 0 : i32
    %c0_i32_1 = arith.constant 0 : i32
    %c0_i32_2 = arith.constant 0 : i32
    return %c0_i32, %c0_i32_0, %c0_i32_1 : i32, i32, i32
  }
  func.func @transform_4(%arg0: i32) -> (i32, i32, i32) {
    %c0_i32 = arith.constant 0 : i32
    %c0_i32_0 = arith.constant 0 : i32
    %c0_i32_1 = arith.constant 0 : i32
    %c0_i32_2 = arith.constant 0 : i32
    return %c0_i32, %c0_i32_0, %c0_i32_1 : i32, i32, i32
  }
  func.func @transform_5(%arg0: i32) -> (i32, i32) {
    %c0_i32 = arith.constant 0 : i32
    %c0_i32_0 = arith.constant 0 : i32
    %c0_i32_1 = arith.constant 0 : i32
    return %c0_i32, %c0_i32_0 : i32, i32
  }
  func.func @transform_6(%arg0: i32) -> (i32, i32) {
    %c0_i32 = arith.constant 0 : i32
    %c0_i32_0 = arith.constant 0 : i32
    %c0_i32_1 = arith.constant 0 : i32
    return %c0_i32, %c0_i32_0 : i32, i32
  }
  func.func @transform_7(%arg0: i32) -> (i32, i32) {
    %c0_i32 = arith.constant 0 : i32
    %c0_i32_0 = arith.constant 0 : i32
    return %arg0, %c0_i32 : i32, i32
  }
}

</mosaic_0001>

<bundles_post_ra>
// kernel: tpu_custom_call.1
= control target key start
LH: loop header
LB: loop body
LE: loop exit
PB: predicated region body
PF: predicated region fallthrough
CT: control target
= control target key end

     0   :  { %v1305_v1 = vmov 0.0   ;;  %vm1306_vm0 = vmmov 0   ;;  %s1608_s0 = inlined_call_operand.vmem [shape: bf16[16,128], index: 0, kind: input, shape index: {}]   ;;  %s1609_s1 = inlined_call_operand.vmem [shape: bf16[3,128,128], index: 1, kind: input, shape index: {}]   ;;  %s1610_s2 = inlined_call_operand.vmem [shape: f32[3,1,128], index: 2, kind: input, shape index: {}]   ;;  %s1611_s3 = inlined_call_operand.vmem [shape: bf16[3,128,64], index: 3, kind: input, shape index: {}]   ;;  %s1612_s4 = inlined_call_operand.vmem [shape: f32[3,1,64], index: 4, kind: input, shape index: {}]   ;;  %s1613_s5 = inlined_call_operand.vmem [shape: bf16[64,32], index: 5, kind: input, shape index: {}]   ;;  %s1614_s6 = inlined_call_operand.vmem [shape: f32[1,32], index: 6, kind: input, shape index: {}]   ;;  %s1615_s7 = inlined_call_operand.hbm [shape: f32[16,32], index: 7, kind: output, shape index: {}]  }
   0x1   :  { %v1196_v0 = vld [vmem:[%s1609_s1] sm:$0xff]   ;;  %1059 = vmatprep.subr.bf16.mxu0 %v1305_v1  ;;  %v1197_v2 = vld [vmem:[%s1609_s1 + $0x8] sm:$0xff]   ;;  %1079 = vmatprep.subr.bf16.mxu1 %v1305_v1  ;;  %v1199_v5 = vld [vmem:[%s1609_s1 + $0x10] sm:$0xff]  }
   0x2   :  { %1060 = vmatpush3.bf16.msra.mxu0 %v1196_v0  ;;  %v1198_v3 = vld [vmem:[%s1609_s1 + $0x40] sm:$0xff]   ;;  %1075 = vmatprep.mubr.msk.bf16.mxu0 %vm1306_vm0, %v1305_v1  ;;  %v1200_v4 = vld [vmem:[%s1609_s1 + $0x48] sm:$0xff]   ;;  %v1202_v6 = vld [vmem:[%s1609_s1 + $0x50] sm:$0xff]  }
   0x3   :  { %1061 = vmatprep.subr.bf16.mxu0 %v1305_v1  ;;  %1095 = vmatprep.mubr.msk.bf16.mxu1 %vm1306_vm0, %v1305_v1  ;;  %v1201_v7 = vld [vmem:[%s1609_s1 + $0x18] sm:$0xff]   ;;  %v1203_v9 = vld [vmem:[%s1609_s1 + $0x20] sm:$0xff]   ;;  %v1205_v11 = vld [vmem:[%s1609_s1 + $0x28] sm:$0xff]  }
   0x4   :  { %1080 = vmatpush3.bf16.msra.mxu1 %v1198_v3  ;;  %v1204_v8 = vld [vmem:[%s1609_s1 + $0x58] sm:$0xff]   ;;  %v1206_v10 = vld [vmem:[%s1609_s1 + $0x60] sm:$0xff]   ;;  %v1208_v12 = vld [vmem:[%s1609_s1 + $0x68] sm:$0xff]  }
   0x5   :  { %1081 = vmatprep.subr.bf16.mxu1 %v1305_v1  ;;  %v1207_v13 = vld [vmem:[%s1609_s1 + $0x30] sm:$0xff]   ;;  %v1209_v15 = vld [vmem:[%s1609_s1 + $0x38] sm:$0xff]   ;;  %v1211_v17 = vld [vmem:[%s1608_s0] sm:$0xff]  }
   0x6   :  { %1062 = vmatpush3.bf16.msra.mxu0 %v1197_v2  ;;  %v1210_v14 = vld [vmem:[%s1609_s1 + $0x70] sm:$0xff]   ;;  %v1213_v16 = vld [vmem:[%s1609_s1 + $0x78] sm:$0xff]   ;;  %v1212_v18 = vld [vmem:[%s1609_s1 + $0x80] sm:$0xff]  }
   0x7   :  { %1063 = vmatprep.subr.bf16.mxu0 %v1305_v1  ;;  %v1214_v19 = vld [vmem:[%s1609_s1 + $0x88] sm:$0xff]   ;;  %v1215_v20 = vld [vmem:[%s1609_s1 + $0x90] sm:$0xff]   ;;  %v1216_v21 = vld [vmem:[%s1609_s1 + $0x98] sm:$0xff]  }
   0x8   :  { %1082 = vmatpush3.bf16.msra.mxu1 %v1200_v4 }
   0x9   :  { %1083 = vmatprep.subr.bf16.mxu1 %v1305_v1 }
   0xa   :  { %1064 = vmatpush3.bf16.msra.mxu0 %v1199_v5 }
   0xb   :  { %1065 = vmatprep.subr.bf16.mxu0 %v1305_v1 }
   0xc   :  { %1084 = vmatpush3.bf16.msra.mxu1 %v1202_v6 }
   0xd   :  { %1085 = vmatprep.subr.bf16.mxu1 %v1305_v1 }
   0xe   :  { %1066 = vmatpush3.bf16.msra.mxu0 %v1201_v7 }
   0xf   :  { %1067 = vmatprep.subr.bf16.mxu0 %v1305_v1 }
  0x10   :  { %1086 = vmatpush3.bf16.msra.mxu1 %v1204_v8 }
  0x11   :  { %1087 = vmatprep.subr.bf16.mxu1 %v1305_v1 }
  0x12   :  { %1068 = vmatpush3.bf16.msra.mxu0 %v1203_v9 }
  0x13   :  { %1069 = vmatprep.subr.bf16.mxu0 %v1305_v1 }
  0x14   :  { %1088 = vmatpush3.bf16.msra.mxu1 %v1206_v10 }
  0x15   :  { %1089 = vmatprep.subr.bf16.mxu1 %v1305_v1 }
  0x16   :  { %1070 = vmatpush3.bf16.msra.mxu0 %v1205_v11 }
  0x17   :  { %1071 = vmatprep.subr.bf16.mxu0 %v1305_v1 }
  0x18   :  { %1090 = vmatpush3.bf16.msra.mxu1 %v1208_v12 }
  0x19   :  { %1091 = vmatprep.subr.bf16.mxu1 %v1305_v1 }
  0x1a   :  { %1072 = vmatpush3.bf16.msra.mxu0 %v1207_v13 }
  0x1b   :  { %1073 = vmatprep.subr.bf16.mxu0 %v1305_v1 }
  0x1c   :  { %1092 = vmatpush3.bf16.msra.mxu1 %v1210_v14 }
  0x1d   :  { %1093 = vmatprep.subr.bf16.mxu1 %v1305_v1 }
  0x1e   :  { %1074 = vmatpush3.bf16.msra.mxu0 %v1209_v15 }
  0x1f   :  { %1099 = vmatprep.subr.bf16.mxu0 %v1305_v1 }
  0x20   :  { %1094 = vmatpush3.bf16.msra.mxu1 %v1213_v16 }
  0x21   :  { %1076 = vmatmul.mubr.bf16.vlgmr.msra.gmra.mrb[0].mxu0 %v1211_v17  ;;  %1119 = vmatprep.subr.bf16.mxu1 %v1305_v1 }
  0x22   :  { %1100 = vmatpush3.bf16.msra.mxu0 %v1212_v18  ;;  %1115 = vmatprep.mubr.msk.bf16.mxu0 %vm1306_vm0, %v1305_v1 }
  0x23   :  { %1101 = vmatprep.subr.bf16.mxu0 %v1305_v1  ;;  %1096 = vmatmul.mubr.bf16.vlgmr.msra.gmra.mrb[0].mxu1 %v1211_v17 }
  0x24   :  { %1135 = vmatprep.mubr.msk.bf16.mxu1 %vm1306_vm0, %v1305_v1 }
  0x26   :  { %1102 = vmatpush3.bf16.msra.mxu0 %v1214_v19 }
  0x27   :  { %1103 = vmatprep.subr.bf16.mxu0 %v1305_v1 }
  0x2a   :  { %1104 = vmatpush3.bf16.msra.mxu0 %v1215_v20 }
  0x2b   :  { %1105 = vmatprep.subr.bf16.mxu0 %v1305_v1 }
  0x2c   :  { %12 = vsyncpa [#allocation3], 0  ;;  %v1217_v22 = vld [vmem:[%s1609_s1 + $0xa0] sm:$0xff]   ;;  %v1218_v23 = vld [vmem:[%s1609_s1 + $0xa8] sm:$0xff]   ;;  %vm805_vm1 = vcmask 523264   ;;  %s1307_s17 = smov [#allocation2]  }
  0x2d   :  { %v1219_v24 = vld [vmem:[%s1609_s1 + $0xb0] sm:$0xff]   ;;  %v1220_v25 = vld [vmem:[%s1609_s1 + $0xb8] sm:$0xff]   ;;  %v1221_v26 = vld [vmem:[%s1611_s3] sm:$0xff]   ;;  %s860_s18 = sshll.u32 %s1307_s17, 4  ;;  %vm852_vm2 = vcmask 261120   ;;  %s861_s18 = int_to_ptr.vmem [resolvable:$true] %s860_s18 }
  0x2e   :  { %1106 = vmatpush3.bf16.msra.mxu0 %v1216_v21  ;;  %v1222_v27 = vld [vmem:[%s1611_s3 + $0x40] sm:$0xff]   ;;  %1120 = vmatpush3.bf16.msra.mxu1 %v1221_v26  ;;  %v1223_v28 = vld [vmem:[%s1611_s3 + $0x8] sm:$0xff]   ;;  %v1225_v30 = vld [vmem:[%s1611_s3 + $0x10] sm:$0xff]   ;;  %s1281_s19 = scalar_lea.vmem %s861_s18, 256  ;;  %p1286_p1 = scmp.lt.s32.totalorder %s861_s18, %s861_s18 }
  0x2f   :  { %1107 = vmatprep.subr.bf16.mxu0 %v1305_v1  ;;  %v1224_v29 = vld [vmem:[%s1611_s3 + $0x48] sm:$0xff]   ;;  %1121 = vmatprep.subr.bf16.mxu1 %v1305_v1  ;;  %v1226_v31 = vld [vmem:[%s1611_s3 + $0x50] sm:$0xff]   ;;  %v1227_v32 = vld [vmem:[%s1611_s3 + $0x18] sm:$0xff]   ;;  %p1282_p0 = scmp.ne.s32.totalorder %s861_s18, %s1281_s19  ;;  %p1287_p2 = scmp.lt.s32.totalorder %s1281_s19, %s1281_s19 }
  0x30   :  { %v1228_v33 = vld [vmem:[%s1611_s3 + $0x58] sm:$0xff]   ;;  %v1229_v34 = vld [vmem:[%s1611_s3 + $0x20] sm:$0xff]   ;;  %v1231_v36 = vld [vmem:[%s1611_s3 + $0x28] sm:$0xff]  }
  0x31   :  { %v1230_v35 = vld [vmem:[%s1611_s3 + $0x60] sm:$0xff]   ;;  %v1232_v37 = vld [vmem:[%s1611_s3 + $0x68] sm:$0xff]   ;;  %v1233_v38 = vld [vmem:[%s1611_s3 + $0x30] sm:$0xff]   ;;  %p1288_p3 = por %p1287_p2, %p1286_p1 }
  0x32   :  { %1108 = vmatpush3.bf16.msra.mxu0 %v1217_v22  ;;  %1122 = vmatpush3.bf16.msra.mxu1 %v1223_v28  ;;  %v1234_v39 = vld [vmem:[%s1611_s3 + $0x70] sm:$0xff]   ;;  %v1235_v40 = vld [vmem:[%s1611_s3 + $0x38] sm:$0xff]   ;;  %v871_v42 = vld [vmem:[%s1610_s2] ss:$0 sm:$0xff] }
  0x33   :  { %1109 = vmatprep.subr.bf16.mxu0 %v1305_v1  ;;  %1123 = vmatprep.subr.bf16.mxu1 %v1305_v1  ;;  %v1236_v41 = vld [vmem:[%s1611_s3 + $0x78] sm:$0xff]   ;;  %v898_v44 = vld [vmem:[%s1610_s2 + $0x1] ss:$0 sm:$0xff]  ;;  %v924_v5 = vld [vmem:[%s1610_s2 + $0x2] ss:$0 sm:$0xff]  ;;  %p1289_p4 = pnand %p1288_p3, %p1282_p0 }
  0x34   :  { %v1238_v26 = vld [vmem:[%s1611_s3 + $0x88] sm:$0xff]   ;;  %v1240_v28 = vld [vmem:[%s1611_s3 + $0x98] sm:$0xff]  }
  0x36   :  { %1110 = vmatpush3.bf16.msra.mxu0 %v1218_v23  ;;  %1124 = vmatpush3.bf16.msra.mxu1 %v1225_v30  ;;  %v1242_v30 = vld [vmem:[%s1611_s3 + $0xa8] sm:$0xff]  }
  0x37   :  { %1111 = vmatprep.subr.bf16.mxu0 %v1305_v1  ;;  %1125 = vmatprep.subr.bf16.mxu1 %v1305_v1 }
  0x3a   :  { %1112 = vmatpush3.bf16.msra.mxu0 %v1219_v24  ;;  %1126 = vmatpush3.bf16.msra.mxu1 %v1227_v32  ;;  %v1237_v24 = vld [vmem:[%s1611_s3 + $0x80] sm:$0xff]   ;;  %v1244_v32 = vld [vmem:[%s1611_s3 + $0xb8] sm:$0xff]  }
  0x3b   :  { %1113 = vmatprep.subr.bf16.mxu0 %v1305_v1  ;;  %1127 = vmatprep.subr.bf16.mxu1 %v1305_v1 }
  0x3e   :  { %1114 = vmatpush3.bf16.msra.mxu0 %v1220_v25  ;;  %1128 = vmatpush3.bf16.msra.mxu1 %v1229_v34  ;;  %v1246_v34 = vld [vmem:[%s1613_s5 + $0x8] sm:$0xff]  }
  0x3f   :  { %1139 = vmatprep.subr.bf16.mxu0 %v1305_v1  ;;  %1129 = vmatprep.subr.bf16.mxu1 %v1305_v1 }
  0x41   :  { %1116 = vmatmul.mubr.bf16.vlgmr.msra.gmra.mrb[4].mxu0 %v1211_v17 }
  0x42   :  { %1155 = vmatprep.mubr.msk.bf16.mxu0 %vm1306_vm0, %v1305_v1  ;;  %1140 = vmatpush3.bf16.msra.mxu0 %v1222_v27  ;;  %v1239_v27 = vld [vmem:[%s1611_s3 + $0x90] sm:$0xff]  }
  0x43   :  { %1141 = vmatprep.subr.bf16.mxu0 %v1305_v1  ;;  %1130 = vmatpush3.bf16.msra.mxu1 %v1231_v36  ;;  %v1248_v36 = vld [vmem:[%s1613_s5 + $0x18] sm:$0xff]  }
  0x44   :  { %1131 = vmatprep.subr.bf16.mxu1 %v1305_v1 }
  0x46   :  { %1142 = vmatpush3.bf16.msra.mxu0 %v1224_v29  ;;  %v1241_v29 = vld [vmem:[%s1611_s3 + $0xa0] sm:$0xff]  }
  0x47   :  { %1143 = vmatprep.subr.bf16.mxu0 %v1305_v1  ;;  %1132 = vmatpush3.bf16.msra.mxu1 %v1233_v38 }
  0x48   :  { %1133 = vmatprep.subr.bf16.mxu1 %v1305_v1 }
  0x4a   :  { %1144 = vmatpush3.bf16.msra.mxu0 %v1226_v31  ;;  %v1243_v31 = vld [vmem:[%s1611_s3 + $0xb0] sm:$0xff]  }
  0x4b   :  { %1145 = vmatprep.subr.bf16.mxu0 %v1305_v1  ;;  %1134 = vmatpush3.bf16.msra.mxu1 %v1235_v40 }
  0x4c   :  { %1159 = vmatprep.subr.bf16.mxu1 %v1305_v1 }
  0x4e   :  { %1146 = vmatpush3.bf16.msra.mxu0 %v1228_v33  ;;  %v1245_v33 = vld [vmem:[%s1613_s5] sm:$0xff]  }
  0x4f   :  { %1147 = vmatprep.subr.bf16.mxu0 %v1305_v1 }
  0x52   :  { %1148 = vmatpush3.bf16.msra.mxu0 %v1230_v35  ;;  %v1247_v35 = vld [vmem:[%s1613_s5 + $0x10] sm:$0xff]  }
  0x53   :  { %1149 = vmatprep.subr.bf16.mxu0 %v1305_v1 }
  0x56   :  { %1150 = vmatpush3.bf16.msra.mxu0 %v1232_v37  ;;  %v933_v37 = vld [vmem:[%s1612_s4] ss:$0 sm:$0xff] }
  0x57   :  { %1151 = vmatprep.subr.bf16.mxu0 %v1305_v1 }
  0x5a   :  { %1152 = vmatpush3.bf16.msra.mxu0 %v1234_v39 }
  0x5b   :  { %1153 = vmatprep.subr.bf16.mxu0 %v1305_v1 }
  0x5e   :  { %1154 = vmatpush3.bf16.msra.mxu0 %v1236_v41 }
  0x5f   :  { %1179 = vmatprep.subr.bf16.mxu0 %v1305_v1 }
  0xf4   :  { %v141_v43 = vpop.f32.mrb[0].mxu0 }
  0xf5   :  { %v142_v45 = vadd.f32 %v871_v42, %v141_v43  ;;  %v1077_v46 = vpop.f32.mrb[1].mxu0  ;;  %v959_v43 = vld [vmem:[%s1612_s4 + $0x1] ss:$0 sm:$0xff] }
  0xf6   :  { %v144_v47 = vpop.f32.mrb[2].mxu0  ;;  %v263_v48 = vpop.f32.mrb[0].mxu1 }
  0xf7   :  { %v148_v49 = vmul.f32 0.5, %v142_v45  ;;  %v145_v50 = vadd.f32 %v871_v42, %v144_v47  ;;  %v1078_v51 = vpop.f32.mrb[3].mxu0  ;;  %v264_v52 = vadd.f32 %v898_v44, %v263_v48  ;;  %v1097_v53 = vpop.f32.mrb[1].mxu1 }
  0xf8   :  { %v266_v54 = vpop.f32.mrb[2].mxu1 }
  0xf9   :  { %1249 = vtanh.f32 %v148_v49  ;;  %v149_v55 = vmul.f32 0.5, %v145_v50  ;;  %v267_v56 = vadd.f32 %v898_v44, %v266_v54  ;;  %v1098_v57 = vpop.f32.mrb[3].mxu1 }
  0xfa   :  { %1251 = vtanh.f32 %v264_v52 }
  0xfb   :  { %1253 = vtanh.f32 %v149_v55 }
  0xfc   :  { %1255 = vtanh.f32 %v267_v56 }
 0x103   :  { %v1250_v58 = vpop.eup %1249 }
 0x104   :  { %v1252_v59 = vpop.eup %1251  ;;  %v152_v60 = vadd.f32 1.0, %v1250_v58 }
 0x105   :  { %v1254_v61 = vpop.eup %1253 }
 0x106   :  { %v154_v62 = vmul.f32 0.5, %v152_v60  ;;  %v153_v63 = vadd.f32 1.0, %v1254_v61  ;;  %v1256_v0 = vpop.eup %1255 }
 0x108   :  { %v155_v2 = vmul.f32 0.5, %v153_v63  ;;  %v394_v3 = vmul.f32 %v1252_v59, %v154_v62  ;;  %v985_v62 = vld [vmem:[%s1612_s4 + $0x2] ss:$0 sm:$0xff] }
 0x10a   :  { %v395_v4 = vmul.f32 %v1256_v0, %v155_v2 }
 0x114   :  { %v379_v6 = vpop.f32.mrb[4].mxu0 }
 0x115   :  { %v380_v7 = vadd.f32 %v924_v5, %v379_v6  ;;  %v1117_v8 = vpop.f32.mrb[5].mxu0 }
 0x116   :  { %v382_v9 = vpop.f32.mrb[6].mxu0 }
 0x117   :  { %v386_v10 = vmul.f32 0.5, %v380_v7  ;;  %v383_v11 = vadd.f32 %v924_v5, %v382_v9  ;;  %v1118_v12 = vpop.f32.mrb[7].mxu0 }
 0x119   :  { %1257 = vtanh.f32 %v386_v10  ;;  %v387_v13 = vmul.f32 0.5, %v383_v11 }
 0x11b   :  { %1259 = vtanh.f32 %v387_v13 }
 0x11c   :  { %1261 = vtanh.f32 %v394_v3 }
 0x11d   :  { %1263 = vtanh.f32 %v395_v4 }
 0x123   :  { %v1258_v14 = vpop.eup %1257 }
 0x124   :  { %v390_v15 = vadd.f32 1.0, %v1258_v14 }
 0x125   :  { %v1260_v16 = vpop.eup %1259 }
 0x126   :  { %v392_v17 = vmul.f32 0.5, %v390_v15  ;;  %v391_v18 = vadd.f32 1.0, %v1260_v16  ;;  %v1262_v19 = vpop.eup %1261 }
 0x127   :  { %v1264_v22 = vpop.eup %1263 }
 0x128   :  { %v398_v20 = vmul.f32 %v1262_v19, %v392_v17  ;;  %v393_v21 = vmul.f32 0.5, %v391_v18  ;;  %v994_v19 = vld [vmem:[%s1614_s6] ss:$0 sm:$0xff] }
 0x12a   :  { %v399_v23 = vmul.f32 %v1264_v22, %v393_v21 }
 0x12c   :  { %v400_v25 = vpack.c.bf16 %v399_v23, %v398_v20 }
 0x12e   :  { %1136 = vmatmul.mubr.bf16.vlgmr.msra.gmra.mrb[4].mxu1 %v400_v25  ;;  %1156 = vmatmul.mubr.bf16.vlgmr.msra.gmra.mrb[8].mxu0 %v400_v25 }
 0x12f   :  { %1160 = vmatpush3.bf16.msra.mxu1 %v1237_v24  ;;  %1175 = vmatprep.mubr.msk.bf16.mxu1 %vm1306_vm0, %v1305_v1 }
 0x130   :  { %1161 = vmatprep.subr.bf16.mxu1 %v1305_v1  ;;  %1187 = vmatprep.mubr.msk.bf16.mxu0 %vm1306_vm0, %v1305_v1 }
 0x131   :  { %1180 = vmatpush3.bf16.msra.mxu0 %v1245_v33 }
 0x132   :  { %1181 = vmatprep.subr.bf16.mxu0 %v1305_v1 }
 0x133   :  { %1162 = vmatpush3.bf16.msra.mxu1 %v1238_v26 }
 0x134   :  { %1163 = vmatprep.subr.bf16.mxu1 %v1305_v1 }
 0x135   :  { %1182 = vmatpush3.bf16.msra.mxu0 %v1246_v34 }
 0x136   :  { %1183 = vmatprep.subr.bf16.mxu0 %v1305_v1 }
 0x137   :  { %1164 = vmatpush3.bf16.msra.mxu1 %v1239_v27 }
 0x138   :  { %1165 = vmatprep.subr.bf16.mxu1 %v1305_v1 }
 0x139   :  { %1184 = vmatpush3.bf16.msra.mxu0 %v1247_v35 }
 0x13a   :  { %1185 = vmatprep.subr.bf16.mxu0 %v1305_v1 }
 0x13b   :  { %1166 = vmatpush3.bf16.msra.mxu1 %v1240_v28 }
 0x13c   :  { %1167 = vmatprep.subr.bf16.mxu1 %v1305_v1 }
 0x13d   :  { %1186 = vmatpush3.bf16.msra.mxu0 %v1248_v36 }
 0x13f   :  { %1168 = vmatpush3.bf16.msra.mxu1 %v1241_v29 }
 0x140   :  { %1169 = vmatprep.subr.bf16.mxu1 %v1305_v1 }
 0x143   :  { %1170 = vmatpush3.bf16.msra.mxu1 %v1242_v30 }
 0x144   :  { %1171 = vmatprep.subr.bf16.mxu1 %v1305_v1 }
 0x147   :  { %1172 = vmatpush3.bf16.msra.mxu1 %v1243_v31 }
 0x148   :  { %1173 = vmatprep.subr.bf16.mxu1 %v1305_v1 }
 0x14b   :  { %1174 = vmatpush3.bf16.msra.mxu1 %v1244_v32 }
 0x14e   :  { %1176 = vmatmul.mubr.bf16.vlgmr.msra.gmra.mrb[8].mxu1 %v400_v25 }
 0x201   :  { %v506_v38 = vpop.f32.mrb[4].mxu1  ;;  %v628_v39 = vpop.f32.mrb[8].mxu0 }
 0x202   :  { %v507_v40 = vadd.f32 %v933_v37, %v506_v38  ;;  %v1137_v41 = vpop.f32.mrb[5].mxu1  ;;  %v1157_v42 = vpop.f32.mrb[9].mxu0  ;;  %v629_v49 = vadd.f32 %v959_v43, %v628_v39 }
 0x203   :  { %v509_v44 = vpop.f32.mrb[6].mxu1  ;;  %v631_v1 = vpop.f32.mrb[10].mxu0 }
 0x204   :  { %v513_v45 = vmul.f32 0.5, %v507_v40  ;;  %v510_v46 = vadd.f32 %v933_v37, %v509_v44  ;;  %v1138_v47 = vpop.f32.mrb[7].mxu1  ;;  %v1158_v48 = vpop.f32.mrb[11].mxu0  ;;  %v632_v51 = vadd.f32 %v959_v43, %v631_v1 }
 0x206   :  { %1265 = vtanh.f32 %v513_v45  ;;  %v514_v50 = vmul.f32 0.5, %v510_v46 }
 0x208   :  { %1267 = vtanh.f32 %v514_v50 }
 0x209   :  { %1269 = vtanh.f32 %v629_v49 }
 0x20a   :  { %1271 = vtanh.f32 %v632_v51 }
 0x210   :  { %v1266_v52 = vpop.eup %1265 }
 0x211   :  { %v517_v53 = vadd.f32 1.0, %v1266_v52 }
 0x212   :  { %v1268_v54 = vpop.eup %1267 }
 0x213   :  { %v519_v55 = vmul.f32 0.5, %v517_v53  ;;  %v518_v56 = vadd.f32 1.0, %v1268_v54  ;;  %v1270_v57 = vpop.eup %1269 }
 0x214   :  { %v1272_v60 = vpop.eup %1271 }
 0x215   :  { %v759_v58 = vmul.f32 %v1270_v57, %v519_v55  ;;  %v520_v59 = vmul.f32 0.5, %v518_v56 }
 0x217   :  { %v760_v61 = vmul.f32 %v1272_v60, %v520_v59 }
 0x221   :  { %v744_v63 = vpop.f32.mrb[8].mxu1 }
 0x222   :  { %v745_v0 = vadd.f32 %v985_v62, %v744_v63  ;;  %v1177_v2 = vpop.f32.mrb[9].mxu1 }
 0x223   :  { %v747_v3 = vpop.f32.mrb[10].mxu1 }
 0x224   :  { %v751_v4 = vmul.f32 0.5, %v745_v0  ;;  %v748_v5 = vadd.f32 %v985_v62, %v747_v3  ;;  %v1178_v6 = vpop.f32.mrb[11].mxu1 }
 0x226   :  { %1273 = vtanh.f32 %v751_v4  ;;  %v752_v7 = vmul.f32 0.5, %v748_v5 }
 0x228   :  { %1275 = vtanh.f32 %v752_v7 }
 0x229   :  { %1277 = vtanh.f32 %v759_v58 }
 0x22a   :  { %1279 = vtanh.f32 %v760_v61 }
 0x230   :  { %v1274_v8 = vpop.eup %1273 }
 0x231   :  { %v755_v9 = vadd.f32 1.0, %v1274_v8 }
 0x232   :  { %v1276_v10 = vpop.eup %1275 }
 0x233   :  { %v757_v11 = vmul.f32 0.5, %v755_v9  ;;  %v756_v12 = vadd.f32 1.0, %v1276_v10  ;;  %v1278_v13 = vpop.eup %1277 }
 0x234   :  { %v1280_v16 = vpop.eup %1279 }
 0x235   :  { %v763_v14 = vmul.f32 %v1278_v13, %v757_v11  ;;  %v758_v15 = vmul.f32 0.5, %v756_v12 }
 0x237   :  { %v764_v17 = vmul.f32 %v1280_v16, %v758_v15 }
 0x239   :  { %v765_v18 = vpack.c.bf16 %v764_v17, %v763_v14 }
 0x23b   :  { %1188 = vmatmul.mubr.msk.bf16.vlgmr.msra.gmra.mrb[12].mxu0 %vm805_vm1, %v765_v18 }
 0x30e   :  { %v843_v20 = vpop.f32.mrb[12].mxu0 }
 0x30f   :  { %v844_v21 = vadd.f32 %v994_v19, %v843_v20  ;;  %v1189_v22 = vpop.f32.mrb[13].mxu0 }
 0x310   :  { %v846_v23 = vpop.f32.mrb[14].mxu0 }
 0x311   :  { %v850_v24 = vmax.f32 %v844_v21, 0.0  ;;  %v847_v25 = vadd.f32 %v994_v19, %v846_v23  ;;  %v1190_v26 = vpop.f32.mrb[15].mxu0 }
 0x313   :  { %853 = vst.msk [vmem:[#allocation2] sm:$0xff] %vm852_vm2, %v850_v24  ;;  %v851_v27 = vmax.f32 %v847_v25, 0.0 }
 0x315   :  { %854 = vst.msk [vmem:[#allocation2 + $0x8] sm:$0xff] %vm852_vm2, %v851_v27 }
 0x316   :  { %1292 = shalt.err (!%p1289_p4)
}
 0x317   :  { %s1293_s21 = scalar_lea.hbm %s1615_s7, 256 }
 0x318   :  { %p1294_p5 = scmp.ne.s32.totalorder %s1615_s7, %s1293_s21  ;;  %p1297_p6 = scmp.lt.u32.totalorder %s1293_s21, %s1615_s7 }
 0x31a   :  { %p1299_p7 = pnand %p1297_p6, %p1294_p5 }
 0x31c   :  { %1302 = shalt.err (!%p1299_p7)
}
 0x31d   :  { %s1308_s26 = smov 128   ;;  %s1309_s27 = smov 8  }
 0x31e   :  { %866 = dma.vmem_to_hbm [thread:$0]  %s861_s18, 256, %s1615_s7, [#allocation3], %s1308_s26, %s1308_s26, %s1309_s27  }
 0x31f   :  { %1303 = dma.done.wait [#allocation3], 256  }
 0x320   :  { %1304 = vsyncadd [#allocation3], 4294967040 }
 0x321   :  { %870 = vsyncpa [#allocation3], 1 }

</bundles_post_ra>
